<compile_context>
chip_gen: v6e
topology: v6e:2x2x1
jax: 0.10.0
libtpu: 0.0.40
codegen_flags: <defaults>
</compile_context>

<pallas_src>
import jax
import jax.numpy as jnp
from jax.experimental import pallas as pl
from jax.experimental.pallas import tpu as pltpu


def _round_up(n, m):
    return (n + m - 1) // m * m


def featurenet_kernel(x_ref, w1_ref, b1_ref, w2_ref, b2_ref, out_ref):
    # Layer 1: (TB, Kp)bf16 @ (Kp, Hp)bf16 -> f32 accum, bias + ReLU in f32.
    x = x_ref[...]
    h = jnp.dot(x, w1_ref[...], preferred_element_type=jnp.float32)
    h = jnp.maximum(h + b1_ref[...], 0.0)
    # Layer 2: downcast h to bf16 for the MXU, accumulate in f32.
    y = jnp.dot(h.astype(jnp.bfloat16), w2_ref[...],
                preferred_element_type=jnp.float32)
    y = jnp.maximum(y + b2_ref[...], 0.0)
    out_ref[...] = y.astype(out_ref.dtype)


def featurenet_forward(x, w1, b1, w2, b2, *, block_b=512):
    """Forward pass of FeatureNet.

    x : [B, state_dim] f32
    w1: [state_dim, 300] f32   (transpose of PyTorch nn.Linear weight)
    b1: [1, 300] f32
    w2: [300, feature_dim] f32
    b2: [1, feature_dim] f32
    returns [B, feature_dim] f32
    """
    B, state_dim = x.shape
    hidden = w1.shape[1]
    feature_dim = w2.shape[1]

    # Lane/MXU-aligned padded dims.
    Kp = _round_up(state_dim, 128)
    Hp = _round_up(hidden, 128)      # 300 -> 384
    Fp = _round_up(feature_dim, 128)

    # Batch tile: multiple of 16 (bf16 sublane packing), capped for VMEM.
    TB = _round_up(min(block_b, _round_up(B, 16)), 16)
    Bp = _round_up(B, TB)

    # Zero-pad + cast. Padding is numerically inert through matmul/ReLU.
    xp = jnp.zeros((Bp, Kp), jnp.bfloat16).at[:B, :state_dim].set(
        x.astype(jnp.bfloat16))
    w1p = jnp.zeros((Kp, Hp), jnp.bfloat16).at[:state_dim, :hidden].set(
        w1.astype(jnp.bfloat16))
    b1p = jnp.zeros((1, Hp), jnp.float32).at[:, :hidden].set(
        b1.astype(jnp.float32))
    w2p = jnp.zeros((Hp, Fp), jnp.bfloat16).at[:hidden, :feature_dim].set(
        w2.astype(jnp.bfloat16))
    b2p = jnp.zeros((1, Fp), jnp.float32).at[:, :feature_dim].set(
        b2.astype(jnp.float32))

    out = pl.pallas_call(
        featurenet_kernel,
        out_shape=jax.ShapeDtypeStruct((Bp, Fp), jnp.float32),
        grid_spec=pltpu.PrefetchScalarGridSpec(
            num_scalar_prefetch=0,
            grid=(Bp // TB,),
            in_specs=[
                pl.BlockSpec((TB, Kp), lambda i: (i, 0)),   # x streams
                pl.BlockSpec((Kp, Hp), lambda i: (0, 0)),   # w1 resident
                pl.BlockSpec((1, Hp), lambda i: (0, 0)),    # b1 resident
                pl.BlockSpec((Hp, Fp), lambda i: (0, 0)),   # w2 resident
                pl.BlockSpec((1, Fp), lambda i: (0, 0)),    # b2 resident
            ],
            out_specs=pl.BlockSpec((TB, Fp), lambda i: (i, 0)),
        ),
        compiler_params=pltpu.CompilerParams(
            dimension_semantics=("parallel",),
        ),
    )(xp, w1p, b1p, w2p, b2p)

    return out[:B, :feature_dim]


def init_featurenet_params(key, state_dim, feature_dim, hidden=300):
    """Deterministic init mimicking PyTorch nn.Linear default
    (uniform(-1/sqrt(fan_in), 1/sqrt(fan_in)))."""
    k1, k2, k3, k4 = jax.random.split(key, 4)
    bound1 = 1.0 / jnp.sqrt(state_dim)
    bound2 = 1.0 / jnp.sqrt(hidden)
    w1 = jax.random.uniform(k1, (state_dim, hidden), jnp.float32, -bound1, bound1)
    b1 = jax.random.uniform(k2, (1, hidden), jnp.float32, -bound1, bound1)
    w2 = jax.random.uniform(k3, (hidden, feature_dim), jnp.float32, -bound2, bound2)
    b2 = jax.random.uniform(k4, (1, feature_dim), jnp.float32, -bound2, bound2)
    return w1, b1, w2, b2


if __name__ == "__main__":
    key = jax.random.PRNGKey(0)
    k_params, k_x = jax.random.split(key)

    batch = 8
    state_dim = 32
    feature_dim = 64

    w1, b1, w2, b2 = init_featurenet_params(k_params, state_dim, feature_dim)
    x = jax.random.normal(k_x, (batch, state_dim), jnp.float32)

    out = featurenet_forward(x, w1, b1, w2, b2)
    out = jax.block_until_ready(out)

    # Reference in plain JAX (f32); kernel uses bf16 MXU inputs with f32
    # accumulation, so compare with a bf16-appropriate tolerance.
    ref = jnp.maximum(jnp.maximum(x @ w1 + b1, 0.0) @ w2 + b2, 0.0)
    assert out.shape == (batch, feature_dim)
    assert jnp.allclose(out, ref, atol=3e-2, rtol=3e-2), (
        float(jnp.max(jnp.abs(out - ref))))

    print("KERNEL_OK")
</pallas_src>

<mosaic_0001>
module attributes {stable_mosaic.version = 11 : i64} {
  func.func @featurenet_kernel(%arg0: i32, %arg1: memref<16x128xbf16, #tpu.memory_space<vmem>>, %arg2: memref<128x384xbf16, #tpu.memory_space<vmem>>, %arg3: memref<1x384xf32, #tpu.memory_space<vmem>>, %arg4: memref<384x128xbf16, #tpu.memory_space<vmem>>, %arg5: memref<1x128xf32, #tpu.memory_space<vmem>>, %arg6: memref<16x128xf32, #tpu.memory_space<vmem>>) attributes {dimension_semantics = [#tpu.dimension_semantics<parallel>], iteration_bounds = array<i64: 1>, scalar_prefetch = 0 : i64, scratch_operands = 0 : i64, tpu.core_type = #tpu.core_type<tc>, window_params = [{transform_indices = @transform_0, window_bounds = array<i64: 16, 128>}, {pipeline_mode = #tpu.pipeline_mode<synchronous>, transform_indices = @transform_1, window_bounds = array<i64: 128, 384>}, {pipeline_mode = #tpu.pipeline_mode<synchronous>, transform_indices = @transform_2, window_bounds = array<i64: 1, 384>}, {pipeline_mode = #tpu.pipeline_mode<synchronous>, transform_indices = @transform_3, window_bounds = array<i64: 384, 128>}, {pipeline_mode = #tpu.pipeline_mode<synchronous>, transform_indices = @transform_4, window_bounds = array<i64: 1, 128>}, {transform_indices = @transform_5, window_bounds = array<i64: 16, 128>}]} {
    %c0 = arith.constant 0 : index
    %c0_0 = arith.constant 0 : index
    %0 = vector.load %arg1[%c0, %c0_0] : memref<16x128xbf16, #tpu.memory_space<vmem>>, vector<16x128xbf16>
    %c0_1 = arith.constant 0 : index
    %c0_2 = arith.constant 0 : index
    %1 = vector.load %arg2[%c0_1, %c0_2] : memref<128x384xbf16, #tpu.memory_space<vmem>>, vector<128x384xbf16>
    %cst = arith.constant dense<0.000000e+00> : vector<16x384xf32>
    %2 = tpu.matmul %0, %1, %cst {dimension_numbers = #tpu.dot_dimension_numbers<[1], [0], [0], [1], [0, 0, 1, 1], [], []>} : vector<16x128xbf16>, vector<128x384xbf16>, vector<16x384xf32> -> vector<16x384xf32>
    %c0_3 = arith.constant 0 : index
    %c0_4 = arith.constant 0 : index
    %3 = vector.load %arg3[%c0_3, %c0_4] : memref<1x384xf32, #tpu.memory_space<vmem>>, vector<1x384xf32>
    %4 = vector.broadcast %3 : vector<1x384xf32> to vector<16x384xf32>
    %5 = arith.addf %2, %4 : vector<16x384xf32>
    %cst_5 = arith.constant 0.000000e+00 : f32
    %6 = vector.broadcast %cst_5 : f32 to vector<16x384xf32>
    %7 = arith.maximumf %5, %6 : vector<16x384xf32>
    %8 = arith.truncf %7 : vector<16x384xf32> to vector<16x384xbf16>
    %c0_6 = arith.constant 0 : index
    %c0_7 = arith.constant 0 : index
    %9 = vector.load %arg4[%c0_6, %c0_7] : memref<384x128xbf16, #tpu.memory_space<vmem>>, vector<384x128xbf16>
    %cst_8 = arith.constant dense<0.000000e+00> : vector<16x128xf32>
    %10 = tpu.matmul %8, %9, %cst_8 {dimension_numbers = #tpu.dot_dimension_numbers<[1], [0], [0], [1], [0, 0, 1, 1], [], []>} : vector<16x384xbf16>, vector<384x128xbf16>, vector<16x128xf32> -> vector<16x128xf32>
    %c0_9 = arith.constant 0 : index
    %c0_10 = arith.constant 0 : index
    %11 = vector.load %arg5[%c0_9, %c0_10] : memref<1x128xf32, #tpu.memory_space<vmem>>, vector<1x128xf32>
    %12 = vector.broadcast %11 : vector<1x128xf32> to vector<16x128xf32>
    %13 = arith.addf %10, %12 : vector<16x128xf32>
    %cst_11 = arith.constant 0.000000e+00 : f32
    %14 = vector.broadcast %cst_11 : f32 to vector<16x128xf32>
    %15 = arith.maximumf %13, %14 : vector<16x128xf32>
    %c0_12 = arith.constant 0 : index
    %c0_13 = arith.constant 0 : index
    %16 = vector.load %arg6[%c0_12, %c0_13] : memref<16x128xf32, #tpu.memory_space<vmem>>, vector<16x128xf32>
    tpu.vector_store %arg6[%c0_12, %c0_13], %15 {strides = array<i32>} : memref<16x128xf32, #tpu.memory_space<vmem>>, vector<16x128xf32>,
    return
  }
  func.func @transform_0(%arg0: i32) -> (i32, i32) {
    %c0_i32 = arith.constant 0 : i32
    %c0_i32_0 = arith.constant 0 : i32
    return %arg0, %c0_i32 : i32, i32
  }
  func.func @transform_1(%arg0: i32) -> (i32, i32) {
    %c0_i32 = arith.constant 0 : i32
    %c0_i32_0 = arith.constant 0 : i32
    %c0_i32_1 = arith.constant 0 : i32
    return %c0_i32, %c0_i32_0 : i32, i32
  }
  func.func @transform_2(%arg0: i32) -> (i32, i32) {
    %c0_i32 = arith.constant 0 : i32
    %c0_i32_0 = arith.constant 0 : i32
    %c0_i32_1 = arith.constant 0 : i32
    return %c0_i32, %c0_i32_0 : i32, i32
  }
  func.func @transform_3(%arg0: i32) -> (i32, i32) {
    %c0_i32 = arith.constant 0 : i32
    %c0_i32_0 = arith.constant 0 : i32
    %c0_i32_1 = arith.constant 0 : i32
    return %c0_i32, %c0_i32_0 : i32, i32
  }
  func.func @transform_4(%arg0: i32) -> (i32, i32) {
    %c0_i32 = arith.constant 0 : i32
    %c0_i32_0 = arith.constant 0 : i32
    %c0_i32_1 = arith.constant 0 : i32
    return %c0_i32, %c0_i32_0 : i32, i32
  }
  func.func @transform_5(%arg0: i32) -> (i32, i32) {
    %c0_i32 = arith.constant 0 : i32
    %c0_i32_0 = arith.constant 0 : i32
    return %arg0, %c0_i32 : i32, i32
  }
}

</mosaic_0001>

<bundles_post_ra>
// kernel: tpu_custom_call.1
= control target key start
LH: loop header
LB: loop body
LE: loop exit
PB: predicated region body
PF: predicated region fallthrough
CT: control target
= control target key end

     0   :  { %10 = vsyncpa [#allocation3], 0  ;;  %s1011_s0 = inlined_call_operand.hbm [shape: bf16[16,128], index: 0, kind: input, shape index: {}]   ;;  %s1012_s1 = inlined_call_operand.hbm [shape: bf16[128,384], index: 1, kind: input, shape index: {}]   ;;  %s1013_s2 = inlined_call_operand.vmem [shape: f32[1,384], index: 2, kind: input, shape index: {}]   ;;  %s1014_s3 = inlined_call_operand.hbm [shape: bf16[384,128], index: 3, kind: input, shape index: {}]   ;;  %s1015_s4 = inlined_call_operand.vmem [shape: f32[1,128], index: 4, kind: input, shape index: {}]   ;;  %s1016_s5 = inlined_call_operand.hbm [shape: f32[16,128], index: 5, kind: output, shape index: {}]  }
   0x1   :  { %11 = vsyncpa [#allocation6], 0 }
   0x2   :  { %12 = vsyncpa [#allocation4], 0  ;;  %s930_s18 = smov [#allocation5]  }
   0x3   :  { %s30_s19 = sshll.u32 %s930_s18, 4  ;;  %s31_s19 = int_to_ptr.vmem [resolvable:$true] %s30_s19 }
   0x4   :  { %s852_s20 = scalar_lea.vmem %s31_s19, 3072  ;;  %p857_p1 = scmp.lt.s32.totalorder %s31_s19, %s31_s19 }
   0x5   :  { %p853_p0 = scmp.ne.s32.totalorder %s31_s19, %s852_s20  ;;  %p858_p2 = scmp.lt.s32.totalorder %s852_s20, %s852_s20 }
   0x7   :  { %p859_p3 = por %p858_p2, %p857_p1 }
   0x9   :  { %p860_p4 = pnand %p859_p3, %p853_p0 }
   0xb   :  { %863 = shalt.err (!%p860_p4)
}
   0xc   :  { %s931_s21 = smov 192   ;;  %s932_s22 = smov 12  }
   0xd   :  { %36 = dma.hbm_to_vmem [thread:$0]  %s1012_s1, 3072, %s31_s19, [#allocation6], %s931_s21, %s931_s21, %s932_s22  }
   0xe   :  { %s933_s25 = smov [#allocation2]  }
   0xf   :  { %s18_s26 = sshll.u32 %s933_s25, 4  ;;  %s19_s26 = int_to_ptr.vmem [resolvable:$true] %s18_s26 }
  0x10   :  { %s872_s27 = scalar_lea.vmem %s19_s26, 128  ;;  %p877_p6 = scmp.lt.s32.totalorder %s19_s26, %s19_s26 }
  0x11   :  { %p873_p5 = scmp.ne.s32.totalorder %s19_s26, %s872_s27  ;;  %p878_p7 = scmp.lt.s32.totalorder %s872_s27, %s872_s27 }
  0x13   :  { %p879_p8 = por %p878_p7, %p877_p6 }
  0x15   :  { %p880_p9 = pnand %p879_p8, %p873_p5 }
  0x17   :  { %883 = shalt.err (!%p880_p9)
}
  0x18   :  { %s934_s28 = smov 64   ;;  %s935_s29 = smov 4  }
  0x19   :  { %24 = dma.hbm_to_vmem [thread:$0]  %s1011_s0, 128, %s19_s26, [#allocation3], %s934_s28, %s934_s28, %s935_s29  }
  0x1a   :  { %s936_s7 = smov [#allocation7]  }
  0x1b   :  { %s44_s8 = sshll.u32 %s936_s7, 4  ;;  %s45_s8 = int_to_ptr.vmem [resolvable:$true] %s44_s8 }
  0x1c   :  { %s892_s1 = scalar_lea.vmem %s45_s8, 3072  ;;  %p897_p11 = scmp.lt.s32.totalorder %s45_s8, %s45_s8 }
  0x1d   :  { %p893_p10 = scmp.ne.s32.totalorder %s45_s8, %s892_s1  ;;  %p898_p12 = scmp.lt.s32.totalorder %s892_s1, %s892_s1 }
  0x1f   :  { %p899_p13 = por %p898_p12, %p897_p11 }
  0x21   :  { %p900_p0 = pnand %p899_p13, %p893_p10 }
  0x23   :  { %903 = shalt.err (!%p900_p0)
}
  0x24   :  { %50 = dma.hbm_to_vmem [thread:$0]  %s1014_s3, 3072, %s45_s8, [#allocation6], %s934_s28, %s934_s28, %s935_s29  }
  0x25   :  { %924 = dma.done.wait [#allocation3], 128  }
  0x26   :  { %925 = vsyncadd [#allocation3], 4294967168 }
  0x27   :  { %926 = dma.done.wait [#allocation6], 6144  }
  0x28   :  { %927 = vsyncadd [#allocation6], 4294961152  ;;  %v937_v0 = vmov 0.0   ;;  %vm938_vm0 = vmmov 0   ;;  %v939_v1 = vmov 0   ;;  %v821_v26 = vld [vmem:[#allocation7 + $0x78] sm:$0xff]   ;;  %v99_v51 = vlaneseq }
  0x29   :  { %734 = vmatprep.subr.bf16.mxu1 %v937_v0  ;;  %750 = vmatprep.mubr.msk.bf16.mxu1 %vm938_vm0, %v937_v0  ;;  %v787_v2 = vld [vmem:[#allocation5 + $0xac] ss:$12 sps:$4 sm:$0xff]   ;;  %v789_v3 = vld [vmem:[#allocation5 + $0xb0] ss:$12 sps:$4 sm:$0xff]   ;;  %v790_v4 = vld [vmem:[#allocation5 + $0xa8] ss:$12 sps:$4 sm:$0xff]  }
  0x2a   :  { %280 = vmatprep.mubr.bf16.mxu0 %v939_v1  ;;  %248 = vmatprep.subr.bf16.mxu0 %v787_v2  ;;  %v791_v5 = vld [vmem:[#allocation5 + $0x94] ss:$12 sps:$4 sm:$0xff]   ;;  %v793_v6 = vld [vmem:[#allocation5 + $0x98] ss:$12 sps:$4 sm:$0xff]   ;;  %v794_v7 = vld [vmem:[#allocation5 + $0x90] ss:$12 sps:$4 sm:$0xff]  }
  0x2b   :  { %735 = vmatpush3.bf16.msra.mxu1 %v789_v3  ;;  %249 = vmatpush1.bf16.msra.mxu0 %v790_v4  ;;  %v795_v8 = vld [vmem:[#allocation5 + $0x7c] ss:$12 sps:$4 sm:$0xff]   ;;  %v797_v9 = vld [vmem:[#allocation5 + $0x80] ss:$12 sps:$4 sm:$0xff]   ;;  %v798_v10 = vld [vmem:[#allocation5 + $0x78] ss:$12 sps:$4 sm:$0xff]  }
  0x2c   :  { %736 = vmatprep.subr.bf16.mxu1 %v937_v0  ;;  %250 = vmatprep.subr.bf16.mxu0 %v791_v5  ;;  %v799_v11 = vld [vmem:[#allocation5 + $0x64] ss:$12 sps:$4 sm:$0xff]   ;;  %v801_v12 = vld [vmem:[#allocation5 + $0x68] ss:$12 sps:$4 sm:$0xff]   ;;  %v802_v13 = vld [vmem:[#allocation5 + $0x60] ss:$12 sps:$4 sm:$0xff]  }
  0x2d   :  { %v803_v14 = vld [vmem:[#allocation5 + $0x4c] ss:$12 sps:$4 sm:$0xff]   ;;  %v805_v15 = vld [vmem:[#allocation5 + $0x50] ss:$12 sps:$4 sm:$0xff]   ;;  %v806_v16 = vld [vmem:[#allocation5 + $0x48] ss:$12 sps:$4 sm:$0xff]  }
  0x2e   :  { %v807_v17 = vld [vmem:[#allocation5 + $0x34] ss:$12 sps:$4 sm:$0xff]   ;;  %v809_v18 = vld [vmem:[#allocation5 + $0x38] ss:$12 sps:$4 sm:$0xff]   ;;  %v810_v19 = vld [vmem:[#allocation5 + $0x30] ss:$12 sps:$4 sm:$0xff]  }
  0x2f   :  { %737 = vmatpush3.bf16.msra.mxu1 %v793_v6  ;;  %251 = vmatpush1.bf16.msra.mxu0 %v794_v7  ;;  %v811_v20 = vld [vmem:[#allocation5 + $0x1c] ss:$12 sps:$4 sm:$0xff]   ;;  %v813_v21 = vld [vmem:[#allocation5 + $0x20] ss:$12 sps:$4 sm:$0xff]   ;;  %v814_v22 = vld [vmem:[#allocation5 + $0x18] ss:$12 sps:$4 sm:$0xff]  }
  0x30   :  { %738 = vmatprep.subr.bf16.mxu1 %v937_v0  ;;  %252 = vmatprep.subr.bf16.mxu0 %v795_v8  ;;  %v815_v23 = vld [vmem:[#allocation5 + $0x4] ss:$12 sps:$4 sm:$0xff]   ;;  %v817_v24 = vld [vmem:[#allocation5 + $0x8] ss:$12 sps:$4 sm:$0xff]   ;;  %v818_v25 = vld [vmem:[#allocation5] ss:$12 sps:$4 sm:$0xff]  }
  0x31   :  { %v819_v27 = vld [vmem:[#allocation2] sm:$0xff]   ;;  %v823_v30 = vld [vmem:[#allocation7 + $0xb0] sm:$0xff]   ;;  %v827_v33 = vld [vmem:[#allocation7 + $0x68] sm:$0xff]   ;;  %v100_v52 = vshrl.u32 %v99_v51, 7  ;;  %s940_s12 = smov [#allocation8]  }
  0x32   :  { %v820_v28 = vld [vmem:[#allocation7 + $0xb8] sm:$0xff]   ;;  %v824_v31 = vld [vmem:[#allocation7 + $0x70] sm:$0xff]   ;;  %v826_v34 = vld [vmem:[#allocation7 + $0xa8] sm:$0xff]   ;;  %s631_s13 = sshll.u32 %s940_s12, 4  ;;  %s632_s13 = int_to_ptr.vmem [resolvable:$true] %s631_s13 }
  0x33   :  { %739 = vmatpush3.bf16.msra.mxu1 %v797_v9  ;;  %253 = vmatpush1.bf16.msra.mxu0 %v798_v10  ;;  %v822_v29 = vld [vmem:[#allocation7 + $0x38] sm:$0xff]   ;;  %v825_v32 = vld [vmem:[#allocation7 + $0x30] sm:$0xff]   ;;  %v828_v35 = vld [vmem:[#allocation7 + $0x28] sm:$0xff]   ;;  %v109_v53 = vsub.s32 2, %v100_v52  ;;  %v105_v56 = vsub.s32 1, %v100_v52  ;;  %v101_v57 = vsub.s32 0, %v100_v52  ;;  %p909_p2 = scmp.lt.s32.totalorder %s632_s13, %s632_s13 }
  0x34   :  { %740 = vmatprep.subr.bf16.mxu1 %v937_v0  ;;  %254 = vmatprep.subr.bf16.mxu0 %v799_v11  ;;  %v830_v36 = vld [vmem:[#allocation7 + $0x60] sm:$0xff]   ;;  %v833_v39 = vld [vmem:[#allocation7 + $0x58] sm:$0xff]   ;;  %v835_v42 = vld [vmem:[#allocation7 + $0x90] sm:$0xff]   ;;  %s904_s14 = scalar_lea.vmem %s632_s13, 256 }
  0x35   :  { %v829_v37 = vld [vmem:[#allocation7 + $0xa0] sm:$0xff]   ;;  %v832_v40 = vld [vmem:[#allocation7 + $0x98] sm:$0xff]   ;;  %v836_v43 = vld [vmem:[#allocation7 + $0x50] sm:$0xff]   ;;  %p905_p1 = scmp.ne.s32.totalorder %s632_s13, %s904_s14  ;;  %p910_p3 = scmp.lt.s32.totalorder %s904_s14, %s904_s14 }
  0x36   :  { %v831_v38 = vld [vmem:[#allocation7 + $0x20] sm:$0xff]   ;;  %v834_v41 = vld [vmem:[#allocation7 + $0x18] sm:$0xff]   ;;  %v837_v44 = vld [vmem:[#allocation7 + $0x10] sm:$0xff]  }
  0x37   :  { %741 = vmatpush3.bf16.msra.mxu1 %v801_v12  ;;  %255 = vmatpush1.bf16.msra.mxu0 %v802_v13  ;;  %v838_v45 = vld [vmem:[#allocation7 + $0x88] sm:$0xff]   ;;  %v841_v48 = vld [vmem:[#allocation7 + $0x80] sm:$0xff]   ;;  %v97_v54 = vld [vmem:[%s1013_s2] sm:$0x7]  ;;  %p911_p4 = por %p910_p3, %p909_p2 }
  0x38   :  { %742 = vmatprep.subr.bf16.mxu1 %v937_v0  ;;  %256 = vmatprep.subr.bf16.mxu0 %v803_v14  ;;  %v839_v46 = vld [vmem:[#allocation7 + $0x48] sm:$0xff]   ;;  %v842_v49 = vld [vmem:[#allocation7 + $0x40] sm:$0xff]   ;;  %v110_v55 = vrot.slane %v97_v54, %v109_v53  ;;  %v106_v62 = vrot.slane %v97_v54, %v105_v56  ;;  %v102_v63 = vrot.slane %v97_v54, %v101_v57 }
  0x39   :  { %v840_v47 = vld [vmem:[#allocation7 + $0x8] sm:$0xff]   ;;  %v843_v50 = vld [vmem:[#allocation7] sm:$0xff]   ;;  %p912_p5 = pnand %p911_p4, %p905_p1 }
  0x3b   :  { %743 = vmatpush3.bf16.msra.mxu1 %v805_v15  ;;  %257 = vmatpush1.bf16.msra.mxu0 %v806_v16 }
  0x3c   :  { %744 = vmatprep.subr.bf16.mxu1 %v937_v0  ;;  %258 = vmatprep.subr.bf16.mxu0 %v807_v17 }
  0x3f   :  { %745 = vmatpush3.bf16.msra.mxu1 %v809_v18  ;;  %259 = vmatpush1.bf16.msra.mxu0 %v810_v19 }
  0x40   :  { %746 = vmatprep.subr.bf16.mxu1 %v937_v0  ;;  %260 = vmatprep.subr.bf16.mxu0 %v811_v20 }
  0x43   :  { %747 = vmatpush3.bf16.msra.mxu1 %v813_v21  ;;  %261 = vmatpush1.bf16.msra.mxu0 %v814_v22 }
  0x44   :  { %748 = vmatprep.subr.bf16.mxu1 %v937_v0  ;;  %262 = vmatprep.subr.bf16.mxu0 %v815_v23  ;;  %v669_v23 = vld [vmem:[%s1015_s4] ss:$0 sm:$0xff] }
  0x47   :  { %749 = vmatpush3.bf16.msra.mxu1 %v817_v24  ;;  %263 = vmatpush1.bf16.msra.mxu0 %v818_v25 }
  0x48   :  { %754 = vmatprep.subr.bf16.mxu1 %v937_v0  ;;  %703 = vmatprep.subr.bf16.mxu0 %v821_v26 }
  0x4a   :  { %751 = vmatmul.mubr.bf16.vlgmr.msra.gmra.mxu1 %v819_v27  ;;  %281 = vmatmul.mubr.bf16.vlgmr.msra.gmra.mxu0 %v819_v27 }
  0x4b   :  { %755 = vmatpush3.bf16.msra.mxu1 %v820_v28  ;;  %704 = vmatpush3.bf16.msra.mxu0 %v822_v29 }
  0x4c   :  { %756 = vmatprep.subr.bf16.mxu1 %v937_v0  ;;  %705 = vmatprep.subr.bf16.mxu0 %v824_v31 }
  0x4d   :  { %770 = vmatprep.mubr.msk.bf16.mxu1 %vm938_vm0, %v937_v0 }
  0x4f   :  { %757 = vmatpush3.bf16.msra.mxu1 %v823_v30  ;;  %706 = vmatpush3.bf16.msra.mxu0 %v825_v32 }
  0x50   :  { %758 = vmatprep.subr.bf16.mxu1 %v937_v0  ;;  %707 = vmatprep.subr.bf16.mxu0 %v827_v33 }
  0x53   :  { %759 = vmatpush3.bf16.msra.mxu1 %v826_v34  ;;  %708 = vmatpush3.bf16.msra.mxu0 %v828_v35 }
  0x54   :  { %760 = vmatprep.subr.bf16.mxu1 %v937_v0  ;;  %709 = vmatprep.subr.bf16.mxu0 %v830_v36 }
  0x57   :  { %761 = vmatpush3.bf16.msra.mxu1 %v829_v37  ;;  %710 = vmatpush3.bf16.msra.mxu0 %v831_v38 }
  0x58   :  { %762 = vmatprep.subr.bf16.mxu1 %v937_v0  ;;  %711 = vmatprep.subr.bf16.mxu0 %v833_v39 }
  0x5b   :  { %763 = vmatpush3.bf16.msra.mxu1 %v832_v40  ;;  %712 = vmatpush3.bf16.msra.mxu0 %v834_v41 }
  0x5c   :  { %764 = vmatprep.subr.bf16.mxu1 %v937_v0  ;;  %713 = vmatprep.subr.bf16.mxu0 %v836_v43 }
  0x5f   :  { %765 = vmatpush3.bf16.msra.mxu1 %v835_v42  ;;  %714 = vmatpush3.bf16.msra.mxu0 %v837_v44 }
  0x60   :  { %766 = vmatprep.subr.bf16.mxu1 %v937_v0  ;;  %715 = vmatprep.subr.bf16.mxu0 %v839_v46 }
  0x63   :  { %767 = vmatpush3.bf16.msra.mxu1 %v838_v45  ;;  %716 = vmatpush3.bf16.msra.mxu0 %v840_v47 }
  0x64   :  { %768 = vmatprep.subr.bf16.mxu1 %v937_v0  ;;  %717 = vmatprep.subr.bf16.mxu0 %v842_v49 }
  0x67   :  { %769 = vmatpush3.bf16.msra.mxu1 %v841_v48  ;;  %718 = vmatpush3.bf16.msra.mxu0 %v843_v50 }
 0x10a   :  { %v325_v58 = vpop.f32.mrf.mxu1  ;;  %v282_v60 = vpop.f32.mrf.mxu0 }
 0x10b   :  { %v326_v59 = vadd.f32 %v325_v58, %v110_v55  ;;  %v283_v8 = vadd.f32 %v282_v60, %v102_v63 }
 0x10c   :  { %v752_v61 = vpop.f32.mrf.mxu1  ;;  %v284_v0 = vpop.f32.mrf.mxu0 }
 0x10d   :  { %v334_v2 = vmax.f32 %v326_v59, 0.0  ;;  %v285_v5 = vadd.f32 %v284_v0, %v106_v62  ;;  %v332_v16 = vmax.f32 %v283_v8, 0.0 }
 0x10e   :  { %v328_v1 = vpop.f32.mrf.mxu1  ;;  %v286_v4 = vpop.f32.mrf.mxu0 }
 0x10f   :  { %v329_v3 = vadd.f32 %v328_v1, %v110_v55  ;;  %v287_v6 = vadd.f32 %v286_v4, %v102_v63  ;;  %v333_v14 = vmax.f32 %v285_v5, 0.0 }
 0x110   :  { %v753_v7 = vpop.f32.mrf.mxu1  ;;  %v288_v10 = vpop.f32.mrf.mxu0 }
 0x111   :  { %v337_v9 = vmax.f32 %v329_v3, 0.0  ;;  %v289_v11 = vadd.f32 %v288_v10, %v106_v62  ;;  %v335_v13 = vmax.f32 %v287_v6, 0.0 }
 0x113   :  { %v340_v12 = vpack.c.bf16 %v337_v9, %v334_v2  ;;  %v336_v15 = vmax.f32 %v289_v11, 0.0  ;;  %v338_v18 = vpack.c.bf16 %v335_v13, %v332_v16 }
 0x115   :  { %771 = vmatmul.mubr.bf16.vlgmr.msra.gmra.mxu1 %v340_v12  ;;  %v339_v17 = vpack.c.bf16 %v336_v15, %v333_v14 }
 0x117   :  { %572 = vmatprep.mubr.bf16.mxu0 %v339_v17 }
 0x118   :  { %573 = vmatmul.mubr.bf16.vlgmr.msra.gmra.mxu0 %v338_v18 }
 0x1d5   :  { %v615_v19 = vpop.f32.mrf.mxu1 }
 0x1d7   :  { %v772_v20 = vpop.f32.mrf.mxu1 }
 0x1d8   :  { %v719_v21 = vpop.f32.mrf.mxu0 }
 0x1d9   :  { %v618_v22 = vpop.f32.mrf.mxu1 }
 0x1da   :  { %v720_v24 = vpop.f32.mrf.mxu0 }
 0x1db   :  { %v773_v25 = vpop.f32.mrf.mxu1  ;;  %v721_v26 = vadd.f32 %v720_v24, %v719_v21 }
 0x1dc   :  { %v722_v27 = vpop.f32.mrf.mxu0 }
 0x1dd   :  { %v575_v28 = vadd.f32 %v721_v26, %v669_v23 }
 0x1de   :  { %v723_v29 = vpop.f32.mrf.mxu0 }
 0x1df   :  { %v616_v30 = vadd.f32 %v615_v19, %v575_v28  ;;  %v724_v31 = vadd.f32 %v723_v29, %v722_v27 }
 0x1e1   :  { %v622_v32 = vmax.f32 %v616_v30, 0.0  ;;  %v578_v33 = vadd.f32 %v724_v31, %v669_v23 }
 0x1e3   :  { %624 = vst [vmem:[#allocation8] sm:$0xff] %v622_v32  ;;  %v619_v34 = vadd.f32 %v618_v22, %v578_v33 }
 0x1e5   :  { %v623_v35 = vmax.f32 %v619_v34, 0.0 }
 0x1e7   :  { %625 = vst [vmem:[#allocation8 + $0x8] sm:$0xff] %v623_v35 }
 0x1e8   :  { %915 = shalt.err (!%p912_p5)
}
 0x1e9   :  { %s941_s4 = smov 128   ;;  %s942_s15 = smov 8  }
 0x1ea   :  { %637 = dma.vmem_to_hbm [thread:$0]  %s632_s13, 256, %s1016_s5, [#allocation4], %s941_s4, %s941_s4, %s942_s15  }
 0x1eb   :  { %928 = dma.done.wait [#allocation4], 256  }
 0x1ec   :  { %929 = vsyncadd [#allocation4], 4294967040 }
 0x1ed   :  { %641 = vsyncpa [#allocation3], 1 }
 0x1ee   :  { %642 = vsyncpa [#allocation6], 1 }
 0x1ef   :  { %643 = vsyncpa [#allocation4], 1 }

</bundles_post_ra>
